<compile_context>
chip_gen: v7x
topology: tpu7x:2x2x1
jax: 0.10.0
libtpu: 0.0.40
codegen_flags: <defaults>
</compile_context>

<pallas_src>
import functools

import jax
import jax.numpy as jnp
from jax.experimental import pallas as pl
from jax.experimental.pallas import tpu as pltpu


def _mlp_kernel(x_ref, w1_ref, b1_ref, w2_ref, b2_ref, w3_ref, b3_ref, o_ref):
    """Fused 3-layer MLP: matmuls on the MXU (f32 accumulation), bias/ReLU on
    the VPU in f32, everything VMEM-resident."""
    mm_dtype = w1_ref.dtype  # bf16 (default) or f32

    x = x_ref[...]  # already in mm_dtype
    h = jnp.dot(x, w1_ref[...], preferred_element_type=jnp.float32) + b1_ref[...]
    h = jnp.maximum(h, 0.0)                               # f32 elementwise (v5e-safe)

    h = jnp.dot(h.astype(mm_dtype), w2_ref[...],
                preferred_element_type=jnp.float32) + b2_ref[...]
    h = jnp.maximum(h, 0.0)

    o = jnp.dot(h.astype(mm_dtype), w3_ref[...],
                preferred_element_type=jnp.float32) + b3_ref[...]
    o_ref[...] = o.astype(o_ref.dtype)


def _round_up(x, m):
    return ((x + m - 1) // m) * m


def _pick_batch_tile(B, batch_tile):
    """Choose a batch tile that (a) is a multiple of 8 (sublane-aligned),
    (b) never exceeds the batch, and (c) gives >= 2 grid steps for large
    batches so v7x's second TensorCore gets work."""
    if B <= 8:
        return B  # single block; second-to-last dim equals the full array dim
    tb = min(batch_tile, (B // 8) * 8)
    if B >= 512 and (B + tb - 1) // tb < 2:
        tb = max(8, _round_up((B + 1) // 2, 8))
        tb = min(tb, (B // 8) * 8)
    return tb


def _vmem_estimate_bytes(tb, in_dim, h1_dim, h2_dim, out_dim, mm_bytes):
    x_tile = tb * in_dim * mm_bytes * 2                     # double-buffered input
    out_tile = tb * out_dim * 4 * 2                         # double-buffered output
    weights = (in_dim * h1_dim + h1_dim * h2_dim + h2_dim * out_dim) * mm_bytes * 2
    biases = (h1_dim + h2_dim + out_dim) * 4 * 2
    interm = tb * (h1_dim + h2_dim) * 4                     # f32 activations
    return x_tile + out_tile + weights + biases + interm


@functools.partial(jax.jit, static_argnames=("batch_tile", "matmul_dtype"))
def feature_extractor_forward(data, params, *, batch_tile=1024,
                              matmul_dtype=jnp.bfloat16):
    """data: [B, state_dim + action_dim] float32. Returns [B, num_feature] f32."""
    w1, b1, w2, b2, w3, b3 = params
    B, in_dim = data.shape
    h1_dim = w1.shape[1]
    h2_dim = w2.shape[1]
    out_dim = w3.shape[1]

    # MXU operands in matmul_dtype; biases (and all elementwise math) stay f32.
    x = data.astype(matmul_dtype)
    w1 = w1.astype(matmul_dtype)
    w2 = w2.astype(matmul_dtype)
    w3 = w3.astype(matmul_dtype)
    b1 = b1.astype(jnp.float32)
    b2 = b2.astype(jnp.float32)
    b3 = b3.astype(jnp.float32)

    tb = _pick_batch_tile(B, batch_tile)
    grid = (pl.cdiv(B, tb),)   # partial last block handled by Pallas masking

    mm_bytes = jnp.dtype(matmul_dtype).itemsize
    flops = 2 * B * (in_dim * h1_dim + h1_dim * h2_dim + h2_dim * out_dim)
    bytes_accessed = (
        B * in_dim * mm_bytes + B * out_dim * 4
        + (in_dim * h1_dim + h1_dim * h2_dim + h2_dim * out_dim) * mm_bytes
        + (h1_dim + h2_dim + out_dim) * 4)
    cost = pl.CostEstimate(flops=flops, transcendentals=0,
                           bytes_accessed=bytes_accessed)

    # Only raise the scoped-VMEM limit if a very large user tile needs it
    # (v5e default is 16 MiB); the default tb=1024 uses ~2 MiB.
    compiler_kwargs = dict(dimension_semantics=("parallel",))
    est = _vmem_estimate_bytes(tb, in_dim, h1_dim, h2_dim, out_dim, mm_bytes)
    if est > 16 * 1024 * 1024:
        compiler_kwargs["vmem_limit_bytes"] = int(min(est * 3 // 2,
                                                      48 * 1024 * 1024))

    out = pl.pallas_call(
        _mlp_kernel,
        out_shape=jax.ShapeDtypeStruct((B, out_dim), jnp.float32),
        grid_spec=pltpu.PrefetchScalarGridSpec(
            num_scalar_prefetch=0,
            grid=grid,
            in_specs=[
                pl.BlockSpec((tb, in_dim), lambda i: (i, 0)),      # x tile
                # Weight/bias blocks are grid-invariant (index_map always
                # (0, 0)), so Pallas DMAs them into VMEM once.
                pl.BlockSpec((in_dim, h1_dim), lambda i: (0, 0)),  # W1
                pl.BlockSpec((1, h1_dim), lambda i: (0, 0)),       # b1
                pl.BlockSpec((h1_dim, h2_dim), lambda i: (0, 0)),  # W2
                pl.BlockSpec((1, h2_dim), lambda i: (0, 0)),       # b2
                pl.BlockSpec((h2_dim, out_dim), lambda i: (0, 0)), # W3
                pl.BlockSpec((1, out_dim), lambda i: (0, 0)),      # b3
            ],
            out_specs=pl.BlockSpec((tb, out_dim), lambda i: (i, 0)),
        ),
        compiler_params=pltpu.CompilerParams(**compiler_kwargs),
        cost_estimate=cost,
    )(x, w1, b1, w2, b2, w3, b3)

    return out


def init_params(key, state_dim, action_dim, num_feature):
    """Deterministic init mirroring nn.Linear default:
    U(-1/sqrt(fan_in), 1/sqrt(fan_in)).  Weights stored as (in, out)."""
    dims = [(state_dim + action_dim, 256), (256, 128), (128, num_feature)]
    params = []
    for (fan_in, fan_out) in dims:
        key, kw, kb = jax.random.split(key, 3)
        bound = 1.0 / jnp.sqrt(jnp.float32(fan_in))
        w = jax.random.uniform(kw, (fan_in, fan_out), jnp.float32, -bound, bound)
        b = jax.random.uniform(kb, (1, fan_out), jnp.float32, -bound, bound)
        params.extend([w, b])
    return tuple(params)


def reference_forward(data, params):
    w1, b1, w2, b2, w3, b3 = params
    h1 = jnp.maximum(data @ w1 + b1, 0.0)
    h2 = jnp.maximum(h1 @ w2 + b2, 0.0)
    return h2 @ w3 + b3


if __name__ == "__main__":
    state_dim = 12
    action_dim = 4
    num_feature = 32
    batch = 8

    key = jax.random.PRNGKey(0)
    key, kdata, kdata2 = jax.random.split(key, 3)
    data = jax.random.normal(kdata, (batch, state_dim + action_dim), jnp.float32)
    params = init_params(key, state_dim, action_dim, num_feature)

    ref = reference_forward(data, params)

    # 1) f32 MXU path: matches the reference tightly.
    out_f32 = jax.block_until_ready(
        feature_extractor_forward(data, params, matmul_dtype=jnp.float32))
    assert out_f32.shape == (batch, num_feature), out_f32.shape
    assert jnp.allclose(out_f32, ref, atol=1e-4, rtol=1e-4), "f32 mismatch vs reference"

    # 2) Default bf16-operand path (v6e/v7x MXU fast path): looser tolerance.
    out_bf16 = jax.block_until_ready(feature_extractor_forward(data, params))
    assert out_bf16.shape == (batch, num_feature), out_bf16.shape
    assert jnp.allclose(out_bf16, ref, atol=5e-2, rtol=5e-2), "bf16 mismatch vs reference"

    # 3) Non-divisible batch: exercises the partial last block (no pad/slice).
    data2 = jax.random.normal(kdata2, (13, state_dim + action_dim), jnp.float32)
    out2 = jax.block_until_ready(
        feature_extractor_forward(data2, params, batch_tile=8,
                                  matmul_dtype=jnp.float32))
    ref2 = reference_forward(data2, params)
    assert out2.shape == (13, num_feature), out2.shape
    assert jnp.allclose(out2, ref2, atol=1e-4, rtol=1e-4), "partial-block mismatch"

    print("KERNEL_OK")
</pallas_src>

<mosaic_0001>
module attributes {stable_mosaic.version = 11 : i64} {
  func.func @_mlp_kernel(%arg0: i32, %arg1: memref<8x16xf32, #tpu.memory_space<vmem>>, %arg2: memref<16x256xf32, #tpu.memory_space<vmem>>, %arg3: memref<1x256xf32, #tpu.memory_space<vmem>>, %arg4: memref<256x128xf32, #tpu.memory_space<vmem>>, %arg5: memref<1x128xf32, #tpu.memory_space<vmem>>, %arg6: memref<128x32xf32, #tpu.memory_space<vmem>>, %arg7: memref<1x32xf32, #tpu.memory_space<vmem>>, %arg8: memref<8x32xf32, #tpu.memory_space<vmem>>) attributes {dimension_semantics = [#tpu.dimension_semantics<parallel>], iteration_bounds = array<i64: 1>, scalar_prefetch = 0 : i64, scratch_operands = 0 : i64, tpu.core_type = #tpu.core_type<tc>, window_params = [{transform_indices = @transform_0, window_bounds = array<i64: 8, 16>}, {pipeline_mode = #tpu.pipeline_mode<synchronous>, transform_indices = @transform_1, window_bounds = array<i64: 16, 256>}, {pipeline_mode = #tpu.pipeline_mode<synchronous>, transform_indices = @transform_2, window_bounds = array<i64: 1, 256>}, {pipeline_mode = #tpu.pipeline_mode<synchronous>, transform_indices = @transform_3, window_bounds = array<i64: 256, 128>}, {pipeline_mode = #tpu.pipeline_mode<synchronous>, transform_indices = @transform_4, window_bounds = array<i64: 1, 128>}, {pipeline_mode = #tpu.pipeline_mode<synchronous>, transform_indices = @transform_5, window_bounds = array<i64: 128, 32>}, {pipeline_mode = #tpu.pipeline_mode<synchronous>, transform_indices = @transform_6, window_bounds = array<i64: 1, 32>}, {transform_indices = @transform_7, window_bounds = array<i64: 8, 32>}]} {
    %c0 = arith.constant 0 : index
    %c0_0 = arith.constant 0 : index
    %0 = vector.load %arg1[%c0, %c0_0] : memref<8x16xf32, #tpu.memory_space<vmem>>, vector<8x16xf32>
    %c0_1 = arith.constant 0 : index
    %c0_2 = arith.constant 0 : index
    %1 = vector.load %arg2[%c0_1, %c0_2] : memref<16x256xf32, #tpu.memory_space<vmem>>, vector<16x256xf32>
    %cst = arith.constant dense<0.000000e+00> : vector<8x256xf32>
    %2 = tpu.matmul %0, %1, %cst {dimension_numbers = #tpu.dot_dimension_numbers<[1], [0], [0], [1], [0, 0, 1, 1], [], []>} : vector<8x16xf32>, vector<16x256xf32>, vector<8x256xf32> -> vector<8x256xf32>
    %c0_3 = arith.constant 0 : index
    %c0_4 = arith.constant 0 : index
    %3 = vector.load %arg3[%c0_3, %c0_4] : memref<1x256xf32, #tpu.memory_space<vmem>>, vector<1x256xf32>
    %4 = vector.broadcast %3 : vector<1x256xf32> to vector<8x256xf32>
    %5 = arith.addf %2, %4 : vector<8x256xf32>
    %cst_5 = arith.constant 0.000000e+00 : f32
    %6 = vector.broadcast %cst_5 : f32 to vector<8x256xf32>
    %7 = arith.maximumf %5, %6 : vector<8x256xf32>
    %c0_6 = arith.constant 0 : index
    %c0_7 = arith.constant 0 : index
    %8 = vector.load %arg4[%c0_6, %c0_7] : memref<256x128xf32, #tpu.memory_space<vmem>>, vector<256x128xf32>
    %cst_8 = arith.constant dense<0.000000e+00> : vector<8x128xf32>
    %9 = tpu.matmul %7, %8, %cst_8 {dimension_numbers = #tpu.dot_dimension_numbers<[1], [0], [0], [1], [0, 0, 1, 1], [], []>} : vector<8x256xf32>, vector<256x128xf32>, vector<8x128xf32> -> vector<8x128xf32>
    %c0_9 = arith.constant 0 : index
    %c0_10 = arith.constant 0 : index
    %10 = vector.load %arg5[%c0_9, %c0_10] : memref<1x128xf32, #tpu.memory_space<vmem>>, vector<1x128xf32>
    %11 = vector.broadcast %10 : vector<1x128xf32> to vector<8x128xf32>
    %12 = arith.addf %9, %11 : vector<8x128xf32>
    %cst_11 = arith.constant 0.000000e+00 : f32
    %13 = vector.broadcast %cst_11 : f32 to vector<8x128xf32>
    %14 = arith.maximumf %12, %13 : vector<8x128xf32>
    %c0_12 = arith.constant 0 : index
    %c0_13 = arith.constant 0 : index
    %15 = vector.load %arg6[%c0_12, %c0_13] : memref<128x32xf32, #tpu.memory_space<vmem>>, vector<128x32xf32>
    %cst_14 = arith.constant dense<0.000000e+00> : vector<8x32xf32>
    %16 = tpu.matmul %14, %15, %cst_14 {dimension_numbers = #tpu.dot_dimension_numbers<[1], [0], [0], [1], [0, 0, 1, 1], [], []>} : vector<8x128xf32>, vector<128x32xf32>, vector<8x32xf32> -> vector<8x32xf32>
    %c0_15 = arith.constant 0 : index
    %c0_16 = arith.constant 0 : index
    %17 = vector.load %arg7[%c0_15, %c0_16] : memref<1x32xf32, #tpu.memory_space<vmem>>, vector<1x32xf32>
    %18 = vector.broadcast %17 : vector<1x32xf32> to vector<8x32xf32>
    %19 = arith.addf %16, %18 : vector<8x32xf32>
    %c0_17 = arith.constant 0 : index
    %c0_18 = arith.constant 0 : index
    %20 = vector.load %arg8[%c0_17, %c0_18] : memref<8x32xf32, #tpu.memory_space<vmem>>, vector<8x32xf32>
    tpu.vector_store %arg8[%c0_17, %c0_18], %19 {strides = array<i32>} : memref<8x32xf32, #tpu.memory_space<vmem>>, vector<8x32xf32>,
    return
  }
  func.func @transform_0(%arg0: i32) -> (i32, i32) {
    %c0_i32 = arith.constant 0 : i32
    %c0_i32_0 = arith.constant 0 : i32
    return %arg0, %c0_i32 : i32, i32
  }
  func.func @transform_1(%arg0: i32) -> (i32, i32) {
    %c0_i32 = arith.constant 0 : i32
    %c0_i32_0 = arith.constant 0 : i32
    %c0_i32_1 = arith.constant 0 : i32
    return %c0_i32, %c0_i32_0 : i32, i32
  }
  func.func @transform_2(%arg0: i32) -> (i32, i32) {
    %c0_i32 = arith.constant 0 : i32
    %c0_i32_0 = arith.constant 0 : i32
    %c0_i32_1 = arith.constant 0 : i32
    return %c0_i32, %c0_i32_0 : i32, i32
  }
  func.func @transform_3(%arg0: i32) -> (i32, i32) {
    %c0_i32 = arith.constant 0 : i32
    %c0_i32_0 = arith.constant 0 : i32
    %c0_i32_1 = arith.constant 0 : i32
    return %c0_i32, %c0_i32_0 : i32, i32
  }
  func.func @transform_4(%arg0: i32) -> (i32, i32) {
    %c0_i32 = arith.constant 0 : i32
    %c0_i32_0 = arith.constant 0 : i32
    %c0_i32_1 = arith.constant 0 : i32
    return %c0_i32, %c0_i32_0 : i32, i32
  }
  func.func @transform_5(%arg0: i32) -> (i32, i32) {
    %c0_i32 = arith.constant 0 : i32
    %c0_i32_0 = arith.constant 0 : i32
    %c0_i32_1 = arith.constant 0 : i32
    return %c0_i32, %c0_i32_0 : i32, i32
  }
  func.func @transform_6(%arg0: i32) -> (i32, i32) {
    %c0_i32 = arith.constant 0 : i32
    %c0_i32_0 = arith.constant 0 : i32
    %c0_i32_1 = arith.constant 0 : i32
    return %c0_i32, %c0_i32_0 : i32, i32
  }
  func.func @transform_7(%arg0: i32) -> (i32, i32) {
    %c0_i32 = arith.constant 0 : i32
    %c0_i32_0 = arith.constant 0 : i32
    return %arg0, %c0_i32 : i32, i32
  }
}

</mosaic_0001>

<bundles_post_ra>
// kernel: feature_extractor_forward.1
= control target key start
LH: loop header
LB: loop body
LE: loop exit
PB: predicated region body
PF: predicated region fallthrough
CT: control target
= control target key end

     0   :  { %12 = vsyncpa [#allocation3], 0  ;;  %s705_s0 = inlined_call_operand.vmem [shape: f32[8,16], index: 0, kind: input, shape index: {}]   ;;  %s706_s1 = inlined_call_operand.vmem [shape: f32[16,256], index: 1, kind: input, shape index: {}]   ;;  %s707_s2 = inlined_call_operand.vmem [shape: f32[1,256], index: 2, kind: input, shape index: {}]   ;;  %s708_s3 = inlined_call_operand.hbm [shape: f32[256,128], index: 3, kind: input, shape index: {}]   ;;  %s709_s4 = inlined_call_operand.vmem [shape: f32[1,128], index: 4, kind: input, shape index: {}]   ;;  %s710_s5 = inlined_call_operand.vmem [shape: f32[128,32], index: 5, kind: input, shape index: {}]   ;;  %s711_s6 = inlined_call_operand.vmem [shape: f32[1,32], index: 6, kind: input, shape index: {}]   ;;  %s712_s7 = inlined_call_operand.hbm [shape: f32[8,32], index: 7, kind: output, shape index: {}]  }
   0x1   :  { %13 = vsyncpa [#allocation4], 0  ;;  %s560_s24 = smov [#allocation2]   ;;  %s512_s28 = scalar_lea.hbm %s708_s3, 4096 }
   0x2   :  { %s25_s25 = sshll.u32 %s560_s24, 4  ;;  %p513_p0 = scmp.ne.s32.totalorder %s708_s3, %s512_s28  ;;  %s26_s25 = int_to_ptr.vmem [resolvable:$true] %s25_s25 }
   0x3   :  { %p516_p1 = scmp.lt.u32.totalorder %s512_s28, %s708_s3 }
   0x5   :  { %p518_p2 = pnand %p516_p1, %p513_p0 }
   0x7   :  { %521 = shalt.err (!%p518_p2)
}
   0x8   :  { %s522_s10 = scalar_lea.vmem %s26_s25, 4096  ;;  %p527_p4 = scmp.lt.s32.totalorder %s26_s25, %s26_s25 }
   0x9   :  { %p523_p3 = scmp.ne.s32.totalorder %s26_s25, %s522_s10  ;;  %p528_p5 = scmp.lt.s32.totalorder %s522_s10, %s522_s10 }
   0xb   :  { %p529_p6 = por %p528_p5, %p527_p4 }
   0xd   :  { %p530_p7 = pnand %p529_p6, %p523_p3 }
   0xf   :  { %533 = shalt.err (!%p530_p7)
}
  0x10   :  { %s561_s11 = smov 128   ;;  %s562_s12 = smov 8  }
  0x11   :  { %31 = dma.hbm_to_vmem [thread:$0]  %s708_s3, 4096, %s26_s25, [#allocation3], %s561_s11, %s561_s11, %s562_s12  }
  0x12   :  { %556 = dma.done.wait [#allocation3], 4096  }
  0x13   :  { %557 = vsyncadd [#allocation3], 4294963200  ;;  %v563_v0 = vmov 0.0   ;;  %v43_v1 = vld [vmem:[%s706_s1 + $0x8] sm:$0xff]  ;;  %v45_v2 = vld [vmem:[%s706_s1 + $0x18] sm:$0xff]  ;;  %vm58_vm0 = vcmask 130048  }
  0x14   :  { %126 = vmatprep.mubr.f32.mxu0 %v563_v0  ;;  %v42_v3 = vld [vmem:[%s706_s1] sm:$0xff]  ;;  %v445_v4 = vpack.c.bf16 %v45_v2, %v43_v1  ;;  %v44_v5 = vld [vmem:[%s706_s1 + $0x10] sm:$0xff]  ;;  %v152_v9 = vld [vmem:[#allocation2 + $0x88] sm:$0xff]  ;;  %v564_v59 = vmov 0.0|0.0   ;;  %vm565_vm1 = vmmov 0   ;;  %vm338_vm2 = vcmask 261120  }
  0x15   :  { %v151_v6 = vld [vmem:[#allocation2 + $0x80] sm:$0xff]  ;;  %v447_v7 = vpack.c.bf16 %v44_v5, %v42_v3  ;;  %v136_v11 = vld [vmem:[#allocation2 + $0x8] sm:$0xff]  ;;  %v153_v14 = vld [vmem:[#allocation2 + $0x90] sm:$0xff] }
  0x16   :  { %v41_v8 = vld [vmem:[%s705_s0] sm:$0xff]  ;;  %446 = vmatprep.subr.bf16.mxu0 %v445_v4  ;;  %v449_v12 = vpack.c.bf16 %v152_v9, %v151_v6  ;;  %v154_v15 = vld [vmem:[#allocation2 + $0x98] sm:$0xff]  ;;  %v137_v16 = vld [vmem:[#allocation2 + $0x10] sm:$0xff] }
  0x17   :  { %v135_v10 = vld [vmem:[#allocation2] sm:$0xff]  ;;  %448 = vmatpush1.bf16.msra.mxu0 %v447_v7  ;;  %v453_v17 = vpack.c.bf16 %v154_v15, %v153_v14  ;;  %v138_v18 = vld [vmem:[#allocation2 + $0x18] sm:$0xff]  ;;  %v156_v20 = vld [vmem:[#allocation2 + $0xa8] sm:$0xff] }
  0x18   :  { %v451_v13 = vpack.c.bf16 %v136_v11, %v135_v10  ;;  %v155_v19 = vld [vmem:[#allocation2 + $0xa0] sm:$0xff]  ;;  %450 = vmatprep.subr.bf16.mxu1 %v449_v12  ;;  %v455_v21 = vpack.c.bf16 %v138_v18, %v137_v16  ;;  %v140_v24 = vld [vmem:[#allocation2 + $0x28] sm:$0xff]  ;;  %v157_v25 = vld [vmem:[#allocation2 + $0xb0] sm:$0xff]  ;;  %481 = vmatprep.subr.bf16.mxu0 %v564_v59  ;;  %v48_v12 = vlaneseq }
  0x19   :  { %v457_v22 = vpack.c.bf16 %v156_v20, %v155_v19  ;;  %v139_v23 = vld [vmem:[#allocation2 + $0x20] sm:$0xff]  ;;  %v158_v26 = vld [vmem:[#allocation2 + $0xb8] sm:$0xff]  ;;  %v141_v29 = vld [vmem:[#allocation2 + $0x30] sm:$0xff] }
  0x1a   :  { %452 = vmatpush3.bf16.msra.mxu1 %v451_v13  ;;  %355 = vmatmul.mubr.msk.f32.vlgmr.msra.gmra.mrb[0].mxu0 %vm58_vm0, %v41_v8  ;;  %v459_v27 = vpack.c.bf16 %v140_v24, %v139_v23  ;;  %v461_v28 = vpack.c.bf16 %v158_v26, %v157_v25  ;;  %v142_v30 = vld [vmem:[#allocation2 + $0x38] sm:$0xff]  ;;  %v159_v31 = vld [vmem:[#allocation2 + $0xc0] sm:$0xff]  ;;  %v160_v32 = vld [vmem:[#allocation2 + $0xc8] sm:$0xff]  ;;  %v49_v13 = vshrl.u32 %v48_v12, 7 }
  0x1b   :  { %454 = vmatprep.subr.bf16.mxu1 %v453_v17  ;;  %v463_v33 = vpack.c.bf16 %v142_v30, %v141_v29  ;;  %v465_v34 = vpack.c.bf16 %v160_v32, %v159_v31  ;;  %v143_v35 = vld [vmem:[#allocation2 + $0x40] sm:$0xff]  ;;  %v144_v36 = vld [vmem:[#allocation2 + $0x48] sm:$0xff]  ;;  %v161_v37 = vld [vmem:[#allocation2 + $0xd0] sm:$0xff]  ;;  %442 = vmatprep.mubr.msk.f32.mxu0 %vm565_vm1, %v563_v0 }
  0x1c   :  { %v162_v38 = vld [vmem:[#allocation2 + $0xd8] sm:$0xff]  ;;  %v467_v39 = vpack.c.bf16 %v144_v36, %v143_v35  ;;  %v145_v41 = vld [vmem:[#allocation2 + $0x50] sm:$0xff]  ;;  %v163_v43 = vld [vmem:[#allocation2 + $0xe0] sm:$0xff]  ;;  %v50_v14 = vsub.s32 0, %v49_v13  ;;  %v54_v16 = vsub.s32 1, %v49_v13 }
  0x1d   :  { %v469_v40 = vpack.c.bf16 %v162_v38, %v161_v37  ;;  %v146_v42 = vld [vmem:[#allocation2 + $0x58] sm:$0xff]  ;;  %v164_v44 = vld [vmem:[#allocation2 + $0xe8] sm:$0xff]  ;;  %v147_v47 = vld [vmem:[#allocation2 + $0x60] sm:$0xff] }
  0x1e   :  { %456 = vmatpush3.bf16.msra.mxu1 %v455_v21  ;;  %v471_v45 = vpack.c.bf16 %v146_v42, %v145_v41  ;;  %v473_v46 = vpack.c.bf16 %v164_v44, %v163_v43  ;;  %v148_v48 = vld [vmem:[#allocation2 + $0x68] sm:$0xff]  ;;  %v165_v50 = vld [vmem:[#allocation2 + $0xf0] sm:$0xff]  ;;  %v166_v51 = vld [vmem:[#allocation2 + $0xf8] sm:$0xff] }
  0x1f   :  { %458 = vmatprep.subr.bf16.mxu1 %v457_v22  ;;  %v475_v49 = vpack.c.bf16 %v148_v48, %v147_v47  ;;  %v477_v52 = vpack.c.bf16 %v166_v51, %v165_v50  ;;  %v149_v53 = vld [vmem:[#allocation2 + $0x70] sm:$0xff]  ;;  %v150_v54 = vld [vmem:[#allocation2 + $0x78] sm:$0xff]  ;;  %v245_v56 = vld [vmem:[%s710_s5] sm:$0xff] }
  0x20   :  { %v479_v55 = vpack.c.bf16 %v150_v54, %v149_v53  ;;  %v246_v57 = vld [vmem:[%s710_s5 + $0x8] sm:$0xff]  ;;  %v247_v58 = vld [vmem:[%s710_s5 + $0x10] sm:$0xff]  ;;  %v248_v61 = vld [vmem:[%s710_s5 + $0x18] sm:$0xff] }
  0x21   :  { %v482_v60 = vpack.c.bf16 %v246_v57, %v245_v56  ;;  %v485_v62 = vpack.c.bf16 %v248_v61, %v247_v58  ;;  %v249_v63 = vld [vmem:[%s710_s5 + $0x20] sm:$0xff]  ;;  %v250_v1 = vld [vmem:[%s710_s5 + $0x28] sm:$0xff]  ;;  %v251_v3 = vld [vmem:[%s710_s5 + $0x30] sm:$0xff] }
  0x22   :  { %460 = vmatpush3.bf16.msra.mxu1 %v459_v27  ;;  %v488_v2 = vpack.c.bf16 %v250_v1, %v249_v63  ;;  %v252_v4 = vld [vmem:[%s710_s5 + $0x38] sm:$0xff]  ;;  %v253_v6 = vld [vmem:[%s710_s5 + $0x40] sm:$0xff]  ;;  %v254_v7 = vld [vmem:[%s710_s5 + $0x48] sm:$0xff] }
  0x23   :  { %462 = vmatprep.subr.bf16.mxu1 %v461_v28  ;;  %483 = vmatpush3.bf16.msra.mxu0 %v482_v60  ;;  %v491_v5 = vpack.c.bf16 %v252_v4, %v251_v3  ;;  %v494_v8 = vpack.c.bf16 %v254_v7, %v253_v6  ;;  %v255_v9 = vld [vmem:[%s710_s5 + $0x50] sm:$0xff]  ;;  %v256_v10 = vld [vmem:[%s710_s5 + $0x58] sm:$0xff]  ;;  %v46_v15 = vld [vmem:[%s707_s2] sm:$0x3] }
  0x24   :  { %484 = vmatprep.subr.bf16.mxu0 %v564_v59  ;;  %v497_v11 = vpack.c.bf16 %v256_v10, %v255_v9  ;;  %v51_v17 = vrot.slane %v46_v15, %v50_v14  ;;  %v55_v18 = vrot.slane %v46_v15, %v54_v16  ;;  %v257_v25 = vld [vmem:[%s710_s5 + $0x60] sm:$0xff]  ;;  %v258_v26 = vld [vmem:[%s710_s5 + $0x68] sm:$0xff]  ;;  %v259_v28 = vld [vmem:[%s710_s5 + $0x70] sm:$0xff] }
  0x25   :  { %v500_v27 = vpack.c.bf16 %v258_v26, %v257_v25  ;;  %v260_v29 = vld [vmem:[%s710_s5 + $0x78] sm:$0xff]  ;;  %v356_v32 = vld [vmem:[%s709_s4] ss:$0 sm:$0xff]  ;;  %s566_s5 = smov [#allocation5]  }
  0x26   :  { %464 = vmatpush3.bf16.msra.mxu1 %v463_v33  ;;  %v503_v30 = vpack.c.bf16 %v260_v29, %v259_v28  ;;  %v357_v37 = vld [vmem:[%s711_s6] ss:$0 sm:$0xff]  ;;  %s346_s10 = sshll.u32 %s566_s5, 4  ;;  %s347_s10 = int_to_ptr.vmem [resolvable:$true] %s346_s10 }
  0x27   :  { %466 = vmatprep.subr.bf16.mxu1 %v465_v34  ;;  %486 = vmatpush3.bf16.msra.mxu0 %v485_v62  ;;  %s534_s11 = scalar_lea.vmem %s347_s10, 128  ;;  %p539_p9 = scmp.lt.s32.totalorder %s347_s10, %s347_s10 }
  0x28   :  { %487 = vmatprep.subr.bf16.mxu0 %v564_v59  ;;  %p535_p8 = scmp.ne.s32.totalorder %s347_s10, %s534_s11  ;;  %p540_p10 = scmp.lt.s32.totalorder %s534_s11, %s534_s11 }
  0x2a   :  { %468 = vmatpush3.bf16.msra.mxu1 %v467_v39  ;;  %p541_p11 = por %p540_p10, %p539_p9 }
  0x2b   :  { %470 = vmatprep.subr.bf16.mxu1 %v469_v40  ;;  %489 = vmatpush3.bf16.msra.mxu0 %v488_v2 }
  0x2c   :  { %490 = vmatprep.subr.bf16.mxu0 %v564_v59  ;;  %p542_p12 = pnand %p541_p11, %p535_p8 }
  0x2e   :  { %472 = vmatpush3.bf16.msra.mxu1 %v471_v45 }
  0x2f   :  { %474 = vmatprep.subr.bf16.mxu1 %v473_v46  ;;  %492 = vmatpush3.bf16.msra.mxu0 %v491_v5 }
  0x30   :  { %493 = vmatprep.subr.bf16.mxu0 %v564_v59 }
  0x32   :  { %476 = vmatpush3.bf16.msra.mxu1 %v475_v49 }
  0x33   :  { %478 = vmatprep.subr.bf16.mxu1 %v477_v52  ;;  %495 = vmatpush3.bf16.msra.mxu0 %v494_v8 }
  0x34   :  { %496 = vmatprep.subr.bf16.mxu0 %v564_v59 }
  0x36   :  { %480 = vmatpush3.bf16.msra.mxu1 %v479_v55 }
  0x37   :  { %498 = vmatpush3.bf16.msra.mxu0 %v497_v11 }
  0x38   :  { %499 = vmatprep.subr.bf16.mxu0 %v564_v59 }
  0x3b   :  { %501 = vmatpush3.bf16.msra.mxu0 %v500_v27 }
  0x3c   :  { %502 = vmatprep.subr.bf16.mxu0 %v564_v59 }
  0x3f   :  { %504 = vmatpush3.bf16.msra.mxu0 %v503_v30 }
  0xed   :  { %v128_v19 = vpop.f32.mrb[0].mxu0 }
  0xee   :  { %v129_v20 = vadd.f32 %v128_v19, %v51_v17  ;;  %v130_v21 = vpop.f32.mrb[1].mxu0 }
  0xef   :  { %v131_v22 = vadd.f32 %v130_v21, %v55_v18 }
  0xf0   :  { %v133_v24 = vmax.f32 %v129_v20, 0.0 }
  0xf1   :  { %v134_v23 = vmax.f32 %v131_v22, 0.0 }
  0xf3   :  { %238 = vmatprep.mubr.f32.mxu1 %v134_v23 }
  0xf4   :  { %239 = vmatmul.mubr.f32.vlgmr.msra.gmra.mrb[0].mxu1 %v133_v24 }
 0x1c7   :  { %v390_v31 = vpop.f32.mrb[0].mxu1 }
 0x1c8   :  { %v391_v33 = vpop.f32.mrb[1].mxu1 }
 0x1c9   :  { %v392_v34 = vadd.f32 %v391_v33, %v390_v31 }
 0x1cb   :  { %v241_v35 = vadd.f32 %v392_v34, %v356_v32 }
 0x1cd   :  { %v244_v36 = vmax.f32 %v241_v35, 0.0 }
 0x1cf   :  { %443 = vmatmul.mubr.f32.vlgmr.msra.gmra.mrb[2].mxu0 %v244_v36 }
 0x2a2   :  { %v334_v38 = vpop.f32.mrb[2].mxu0 }
 0x2a3   :  { %v335_v39 = vadd.f32 %v357_v37, %v334_v38  ;;  %v444_v0 = vpop.f32.mrb[3].mxu0 }
 0x2a5   :  { %339 = vst.msk [vmem:[#allocation5] sm:$0xff] %vm338_vm2, %v335_v39 }
 0x2a6   :  { %545 = shalt.err (!%p542_p12)
}
 0x2a7   :  { %s546_s13 = scalar_lea.hbm %s712_s7, 128 }
 0x2a8   :  { %p547_p13 = scmp.ne.s32.totalorder %s712_s7, %s546_s13  ;;  %p550_p0 = scmp.lt.u32.totalorder %s546_s13, %s712_s7 }
 0x2aa   :  { %p552_p1 = pnand %p550_p0, %p547_p13 }
 0x2ac   :  { %555 = shalt.err (!%p552_p1)
}
 0x2ad   :  { %349 = dma.vmem_to_hbm [thread:$0]  %s347_s10, 128, %s712_s7, [#allocation4]  }
 0x2ae   :  { %558 = dma.done.wait [#allocation4], 128  }
 0x2af   :  { %559 = vsyncadd [#allocation4], 4294967168 }
 0x2b0   :  { %353 = vsyncpa [#allocation3], 1 }
 0x2b1   :  { %354 = vsyncpa [#allocation4], 1 }

</bundles_post_ra>
